<compile_context>
chip_gen: v7x
topology: tpu7x:2x2x1
jax: 0.10.0
libtpu: 0.0.40
codegen_flags: <defaults>
</compile_context>

<pallas_src>
import jax
import jax.numpy as jnp
from jax.experimental import pallas as pl
from jax.experimental.pallas import tpu as pltpu


def lstm_cell_kernel(x_ref, h_ref, c_ref, wx_ref, wh_ref, b_ref,
                     h_out_ref, c_out_ref):
    # bf16 operands feed the MXU; accumulation and elementwise math stay f32.
    x_b = x_ref[...].astype(jnp.bfloat16)   # (tb, input_size)
    h_b = h_ref[...].astype(jnp.bfloat16)   # (tb, H)

    def gate_pre(g):
        # Accumulator initialised from the (broadcast) bias tile.
        acc = b_ref[g:g + 1, :]                                   # (1, tn) f32
        acc = acc + jnp.dot(x_b, wx_ref[g],
                            preferred_element_type=jnp.float32)   # (tb, tn)
        acc = acc + jnp.dot(h_b, wh_ref[g],
                            preferred_element_type=jnp.float32)
        return acc

    f_t = jax.nn.sigmoid(gate_pre(0))
    i_t = jax.nn.sigmoid(gate_pre(1))
    g_t = jnp.tanh(gate_pre(2))
    o_t = jax.nn.sigmoid(gate_pre(3))

    c_next = f_t * c_ref[...] + i_t * g_t
    h_next = o_t * jnp.tanh(c_next)

    h_out_ref[...] = h_next.astype(h_out_ref.dtype)
    c_out_ref[...] = c_next.astype(c_out_ref.dtype)


def pack_lstm_weights(w_packed, b_packed, input_size, hidden_size):
    """One-time reorganisation of the PyTorch-style packed parameters.

    w_packed: (input_size + hidden, 4*hidden) with gate order
              [forget, input, cell, output] along the 4*hidden axis.
    b_packed: (1, 4*hidden).

    Returns (wx, wh, b):
      wx (4, input_size, hidden) bf16, wh (4, hidden, hidden) bf16,
      b (4, hidden) f32.
    """
    K = input_size + hidden_size
    w4 = w_packed.reshape(K, 4, hidden_size)      # (K, 4, H)
    w4 = jnp.transpose(w4, (1, 0, 2))             # (4, K, H)
    wx = w4[:, :input_size, :].astype(jnp.bfloat16)
    wh = w4[:, input_size:, :].astype(jnp.bfloat16)
    b = b_packed.reshape(4, hidden_size).astype(jnp.float32)
    return wx, wh, b


def lstm_cell_scratch(x, h_prev, c_prev, wx, wh, b, *, block_b=None, block_h=None):
    """Single LSTM-cell step.  x: (B, input_size); h_prev/c_prev: (B, H) f32;
    wx/wh/b as produced by pack_lstm_weights."""
    B, input_size = x.shape
    H = h_prev.shape[1]

    tb = block_b if block_b is not None else min(B, 256)
    tn = block_h if block_h is not None else min(H, 512)
    grid = (pl.cdiv(B, tb), pl.cdiv(H, tn))

    h_next, c_next = pl.pallas_call(
        lstm_cell_kernel,
        grid=grid,
        in_specs=[
            pl.BlockSpec((tb, input_size), lambda i, j: (i, 0)),   # x
            pl.BlockSpec((tb, H), lambda i, j: (i, 0)),            # h_prev (full K)
            pl.BlockSpec((tb, tn), lambda i, j: (i, j)),           # c_prev tile
            pl.BlockSpec((4, input_size, tn), lambda i, j: (0, 0, j)),  # wx
            pl.BlockSpec((4, H, tn), lambda i, j: (0, 0, j)),           # wh
            pl.BlockSpec((4, tn), lambda i, j: (0, j)),                 # bias
        ],
        out_specs=(
            pl.BlockSpec((tb, tn), lambda i, j: (i, j)),
            pl.BlockSpec((tb, tn), lambda i, j: (i, j)),
        ),
        out_shape=(
            jax.ShapeDtypeStruct((B, H), x.dtype),
            jax.ShapeDtypeStruct((B, H), x.dtype),
        ),
        compiler_params=pltpu.CompilerParams(
            dimension_semantics=("parallel", "parallel"),
            vmem_limit_bytes=32 * 1024 * 1024,
        ),
    )(x, h_prev, c_prev, wx, wh, b)
    return h_next, c_next


def reference_lstm_cell(x, h_prev, c_prev, w_packed, b_packed):
    """Pure-JAX f32 reference matching the PyTorch module semantics."""
    hidden = h_prev.shape[1]
    combined = jnp.concatenate([x, h_prev], axis=1)
    gates = combined @ w_packed + b_packed
    f_t = jax.nn.sigmoid(gates[:, 0 * hidden:1 * hidden])
    i_t = jax.nn.sigmoid(gates[:, 1 * hidden:2 * hidden])
    g_t = jnp.tanh(gates[:, 2 * hidden:3 * hidden])
    o_t = jax.nn.sigmoid(gates[:, 3 * hidden:4 * hidden])
    c_next = f_t * c_prev + i_t * g_t
    h_next = o_t * jnp.tanh(c_next)
    return h_next, c_next


if __name__ == "__main__":
    B = 8
    input_size = 32
    hidden_size = 128   # multiple of 128 -> lane-aligned gate tiles & full-width stores

    key = jax.random.PRNGKey(0)
    k_x, k_h, k_c, k_w, k_b = jax.random.split(key, 5)

    x = jax.random.normal(k_x, (B, input_size), dtype=jnp.float32)
    h_prev = jax.random.normal(k_h, (B, hidden_size), dtype=jnp.float32)
    c_prev = jax.random.normal(k_c, (B, hidden_size), dtype=jnp.float32)

    # Deterministic parameter init mimicking nn.Linear default:
    # uniform(-1/sqrt(fan_in), 1/sqrt(fan_in)), fan_in = input_size + hidden_size.
    fan_in = input_size + hidden_size
    bound = 1.0 / jnp.sqrt(jnp.float32(fan_in))
    w_packed = jax.random.uniform(
        k_w, (fan_in, 4 * hidden_size), dtype=jnp.float32,
        minval=-bound, maxval=bound)
    b_packed = jax.random.uniform(
        k_b, (1, 4 * hidden_size), dtype=jnp.float32,
        minval=-bound, maxval=bound)

    # One-time weight reorganisation (per-gate, lane-aligned, bf16).
    wx, wh, b = pack_lstm_weights(w_packed, b_packed, input_size, hidden_size)

    step = jax.jit(lstm_cell_scratch)
    h_next, c_next = step(x, h_prev, c_prev, wx, wh, b)
    jax.block_until_ready((h_next, c_next))

    h_ref, c_ref = reference_lstm_cell(x, h_prev, c_prev, w_packed, b_packed)
    # bf16 matmul operands (f32 accumulation) vs pure-f32 reference -> loosened tolerance.
    assert jnp.allclose(h_next, h_ref, atol=3e-2, rtol=3e-2), "h mismatch"
    assert jnp.allclose(c_next, c_ref, atol=3e-2, rtol=3e-2), "c mismatch"

    print("KERNEL_OK")
</pallas_src>

<mosaic_0001>
module attributes {stable_mosaic.version = 11 : i64} {
  func.func @lstm_cell_kernel(%arg0: i32, %arg1: i32, %arg2: memref<8x32xf32, #tpu.memory_space<vmem>>, %arg3: memref<8x128xf32, #tpu.memory_space<vmem>>, %arg4: memref<8x128xf32, #tpu.memory_space<vmem>>, %arg5: memref<4x32x128xbf16, #tpu.memory_space<vmem>>, %arg6: memref<4x128x128xbf16, #tpu.memory_space<vmem>>, %arg7: memref<4x128xf32, #tpu.memory_space<vmem>>, %arg8: memref<8x128xf32, #tpu.memory_space<vmem>>, %arg9: memref<8x128xf32, #tpu.memory_space<vmem>>) attributes {dimension_semantics = [#tpu.dimension_semantics<parallel>, #tpu.dimension_semantics<parallel>], iteration_bounds = array<i64: 1, 1>, scalar_prefetch = 0 : i64, scratch_operands = 0 : i64, tpu.core_type = #tpu.core_type<tc>, window_params = [{transform_indices = @transform_0, window_bounds = array<i64: 8, 32>}, {transform_indices = @transform_1, window_bounds = array<i64: 8, 128>}, {transform_indices = @transform_2, window_bounds = array<i64: 8, 128>}, {transform_indices = @transform_3, window_bounds = array<i64: 4, 32, 128>}, {transform_indices = @transform_4, window_bounds = array<i64: 4, 128, 128>}, {transform_indices = @transform_5, window_bounds = array<i64: 4, 128>}, {transform_indices = @transform_6, window_bounds = array<i64: 8, 128>}, {transform_indices = @transform_7, window_bounds = array<i64: 8, 128>}]} {
    %c0 = arith.constant 0 : index
    %c0_0 = arith.constant 0 : index
    %0 = vector.load %arg2[%c0, %c0_0] : memref<8x32xf32, #tpu.memory_space<vmem>>, vector<8x32xf32>
    %1 = arith.truncf %0 : vector<8x32xf32> to vector<8x32xbf16>
    %c0_1 = arith.constant 0 : index
    %c0_2 = arith.constant 0 : index
    %2 = vector.load %arg3[%c0_1, %c0_2] : memref<8x128xf32, #tpu.memory_space<vmem>>, vector<8x128xf32>
    %3 = arith.truncf %2 : vector<8x128xf32> to vector<8x128xbf16>
    %c0_3 = arith.constant 0 : index
    %c0_4 = arith.constant 0 : index
    %4 = vector.load %arg7[%c0_3, %c0_4] : memref<4x128xf32, #tpu.memory_space<vmem>>, vector<1x128xf32>
    %c0_5 = arith.constant 0 : index
    %c0_6 = arith.constant 0 : index
    %c0_7 = arith.constant 0 : index
    %5 = vector.load %arg5[%c0_5, %c0_6, %c0_7] : memref<4x32x128xbf16, #tpu.memory_space<vmem>>, vector<1x32x128xbf16>
    %6 = vector.shape_cast %5 : vector<1x32x128xbf16> to vector<32x128xbf16>
    %cst = arith.constant dense<0.000000e+00> : vector<8x128xf32>
    %7 = tpu.matmul %1, %6, %cst {dimension_numbers = #tpu.dot_dimension_numbers<[1], [0], [0], [1], [0, 0, 1, 1], [], []>} : vector<8x32xbf16>, vector<32x128xbf16>, vector<8x128xf32> -> vector<8x128xf32>
    %8 = vector.broadcast %4 : vector<1x128xf32> to vector<8x128xf32>
    %9 = arith.addf %8, %7 : vector<8x128xf32>
    %c0_8 = arith.constant 0 : index
    %c0_9 = arith.constant 0 : index
    %c0_10 = arith.constant 0 : index
    %10 = vector.load %arg6[%c0_8, %c0_9, %c0_10] : memref<4x128x128xbf16, #tpu.memory_space<vmem>>, vector<1x128x128xbf16>
    %11 = vector.shape_cast %10 : vector<1x128x128xbf16> to vector<128x128xbf16>
    %cst_11 = arith.constant dense<0.000000e+00> : vector<8x128xf32>
    %12 = tpu.matmul %3, %11, %cst_11 {dimension_numbers = #tpu.dot_dimension_numbers<[1], [0], [0], [1], [0, 0, 1, 1], [], []>} : vector<8x128xbf16>, vector<128x128xbf16>, vector<8x128xf32> -> vector<8x128xf32>
    %13 = arith.addf %9, %12 : vector<8x128xf32>
    %14 = arith.negf %13 : vector<8x128xf32>
    %15 = math.exp %14 : vector<8x128xf32>
    %cst_12 = arith.constant 1.000000e+00 : f32
    %16 = vector.broadcast %cst_12 : f32 to vector<8x128xf32>
    %17 = arith.addf %16, %15 : vector<8x128xf32>
    %18 = arith.divf %16, %17 : vector<8x128xf32>
    %c1 = arith.constant 1 : index
    %c0_13 = arith.constant 0 : index
    %19 = vector.load %arg7[%c1, %c0_13] : memref<4x128xf32, #tpu.memory_space<vmem>>, vector<1x128xf32>
    %c1_14 = arith.constant 1 : index
    %c0_15 = arith.constant 0 : index
    %c0_16 = arith.constant 0 : index
    %20 = vector.load %arg5[%c1_14, %c0_15, %c0_16] : memref<4x32x128xbf16, #tpu.memory_space<vmem>>, vector<1x32x128xbf16>
    %21 = vector.shape_cast %20 : vector<1x32x128xbf16> to vector<32x128xbf16>
    %cst_17 = arith.constant dense<0.000000e+00> : vector<8x128xf32>
    %22 = tpu.matmul %1, %21, %cst_17 {dimension_numbers = #tpu.dot_dimension_numbers<[1], [0], [0], [1], [0, 0, 1, 1], [], []>} : vector<8x32xbf16>, vector<32x128xbf16>, vector<8x128xf32> -> vector<8x128xf32>
    %23 = vector.broadcast %19 : vector<1x128xf32> to vector<8x128xf32>
    %24 = arith.addf %23, %22 : vector<8x128xf32>
    %c1_18 = arith.constant 1 : index
    %c0_19 = arith.constant 0 : index
    %c0_20 = arith.constant 0 : index
    %25 = vector.load %arg6[%c1_18, %c0_19, %c0_20] : memref<4x128x128xbf16, #tpu.memory_space<vmem>>, vector<1x128x128xbf16>
    %26 = vector.shape_cast %25 : vector<1x128x128xbf16> to vector<128x128xbf16>
    %cst_21 = arith.constant dense<0.000000e+00> : vector<8x128xf32>
    %27 = tpu.matmul %3, %26, %cst_21 {dimension_numbers = #tpu.dot_dimension_numbers<[1], [0], [0], [1], [0, 0, 1, 1], [], []>} : vector<8x128xbf16>, vector<128x128xbf16>, vector<8x128xf32> -> vector<8x128xf32>
    %28 = arith.addf %24, %27 : vector<8x128xf32>
    %29 = arith.negf %28 : vector<8x128xf32>
    %30 = math.exp %29 : vector<8x128xf32>
    %cst_22 = arith.constant 1.000000e+00 : f32
    %31 = vector.broadcast %cst_22 : f32 to vector<8x128xf32>
    %32 = arith.addf %31, %30 : vector<8x128xf32>
    %33 = arith.divf %31, %32 : vector<8x128xf32>
    %c2 = arith.constant 2 : index
    %c0_23 = arith.constant 0 : index
    %34 = vector.load %arg7[%c2, %c0_23] : memref<4x128xf32, #tpu.memory_space<vmem>>, vector<1x128xf32>
    %c2_24 = arith.constant 2 : index
    %c0_25 = arith.constant 0 : index
    %c0_26 = arith.constant 0 : index
    %35 = vector.load %arg5[%c2_24, %c0_25, %c0_26] : memref<4x32x128xbf16, #tpu.memory_space<vmem>>, vector<1x32x128xbf16>
    %36 = vector.shape_cast %35 : vector<1x32x128xbf16> to vector<32x128xbf16>
    %cst_27 = arith.constant dense<0.000000e+00> : vector<8x128xf32>
    %37 = tpu.matmul %1, %36, %cst_27 {dimension_numbers = #tpu.dot_dimension_numbers<[1], [0], [0], [1], [0, 0, 1, 1], [], []>} : vector<8x32xbf16>, vector<32x128xbf16>, vector<8x128xf32> -> vector<8x128xf32>
    %38 = vector.broadcast %34 : vector<1x128xf32> to vector<8x128xf32>
    %39 = arith.addf %38, %37 : vector<8x128xf32>
    %c2_28 = arith.constant 2 : index
    %c0_29 = arith.constant 0 : index
    %c0_30 = arith.constant 0 : index
    %40 = vector.load %arg6[%c2_28, %c0_29, %c0_30] : memref<4x128x128xbf16, #tpu.memory_space<vmem>>, vector<1x128x128xbf16>
    %41 = vector.shape_cast %40 : vector<1x128x128xbf16> to vector<128x128xbf16>
    %cst_31 = arith.constant dense<0.000000e+00> : vector<8x128xf32>
    %42 = tpu.matmul %3, %41, %cst_31 {dimension_numbers = #tpu.dot_dimension_numbers<[1], [0], [0], [1], [0, 0, 1, 1], [], []>} : vector<8x128xbf16>, vector<128x128xbf16>, vector<8x128xf32> -> vector<8x128xf32>
    %43 = arith.addf %39, %42 : vector<8x128xf32>
    %44 = math.tanh %43 : vector<8x128xf32>
    %c3 = arith.constant 3 : index
    %c0_32 = arith.constant 0 : index
    %45 = vector.load %arg7[%c3, %c0_32] : memref<4x128xf32, #tpu.memory_space<vmem>>, vector<1x128xf32>
    %c3_33 = arith.constant 3 : index
    %c0_34 = arith.constant 0 : index
    %c0_35 = arith.constant 0 : index
    %46 = vector.load %arg5[%c3_33, %c0_34, %c0_35] : memref<4x32x128xbf16, #tpu.memory_space<vmem>>, vector<1x32x128xbf16>
    %47 = vector.shape_cast %46 : vector<1x32x128xbf16> to vector<32x128xbf16>
    %cst_36 = arith.constant dense<0.000000e+00> : vector<8x128xf32>
    %48 = tpu.matmul %1, %47, %cst_36 {dimension_numbers = #tpu.dot_dimension_numbers<[1], [0], [0], [1], [0, 0, 1, 1], [], []>} : vector<8x32xbf16>, vector<32x128xbf16>, vector<8x128xf32> -> vector<8x128xf32>
    %49 = vector.broadcast %45 : vector<1x128xf32> to vector<8x128xf32>
    %50 = arith.addf %49, %48 : vector<8x128xf32>
    %c3_37 = arith.constant 3 : index
    %c0_38 = arith.constant 0 : index
    %c0_39 = arith.constant 0 : index
    %51 = vector.load %arg6[%c3_37, %c0_38, %c0_39] : memref<4x128x128xbf16, #tpu.memory_space<vmem>>, vector<1x128x128xbf16>
    %52 = vector.shape_cast %51 : vector<1x128x128xbf16> to vector<128x128xbf16>
    %cst_40 = arith.constant dense<0.000000e+00> : vector<8x128xf32>
    %53 = tpu.matmul %3, %52, %cst_40 {dimension_numbers = #tpu.dot_dimension_numbers<[1], [0], [0], [1], [0, 0, 1, 1], [], []>} : vector<8x128xbf16>, vector<128x128xbf16>, vector<8x128xf32> -> vector<8x128xf32>
    %54 = arith.addf %50, %53 : vector<8x128xf32>
    %55 = arith.negf %54 : vector<8x128xf32>
    %56 = math.exp %55 : vector<8x128xf32>
    %cst_41 = arith.constant 1.000000e+00 : f32
    %57 = vector.broadcast %cst_41 : f32 to vector<8x128xf32>
    %58 = arith.addf %57, %56 : vector<8x128xf32>
    %59 = arith.divf %57, %58 : vector<8x128xf32>
    %c0_42 = arith.constant 0 : index
    %c0_43 = arith.constant 0 : index
    %60 = vector.load %arg4[%c0_42, %c0_43] : memref<8x128xf32, #tpu.memory_space<vmem>>, vector<8x128xf32>
    %61 = arith.mulf %18, %60 : vector<8x128xf32>
    %62 = arith.mulf %33, %44 : vector<8x128xf32>
    %63 = arith.addf %61, %62 : vector<8x128xf32>
    %64 = math.tanh %63 : vector<8x128xf32>
    %65 = arith.mulf %59, %64 : vector<8x128xf32>
    %c0_44 = arith.constant 0 : index
    %c0_45 = arith.constant 0 : index
    %66 = vector.load %arg8[%c0_44, %c0_45] : memref<8x128xf32, #tpu.memory_space<vmem>>, vector<8x128xf32>
    tpu.vector_store %arg8[%c0_44, %c0_45], %65 {strides = array<i32>} : memref<8x128xf32, #tpu.memory_space<vmem>>, vector<8x128xf32>,
    %c0_46 = arith.constant 0 : index
    %c0_47 = arith.constant 0 : index
    %67 = vector.load %arg9[%c0_46, %c0_47] : memref<8x128xf32, #tpu.memory_space<vmem>>, vector<8x128xf32>
    tpu.vector_store %arg9[%c0_46, %c0_47], %63 {strides = array<i32>} : memref<8x128xf32, #tpu.memory_space<vmem>>, vector<8x128xf32>,
    return
  }
  func.func @transform_0(%arg0: i32, %arg1: i32) -> (i32, i32) {
    %c0_i32 = arith.constant 0 : i32
    %c0_i32_0 = arith.constant 0 : i32
    return %arg0, %c0_i32 : i32, i32
  }
  func.func @transform_1(%arg0: i32, %arg1: i32) -> (i32, i32) {
    %c0_i32 = arith.constant 0 : i32
    %c0_i32_0 = arith.constant 0 : i32
    return %arg0, %c0_i32 : i32, i32
  }
  func.func @transform_2(%arg0: i32, %arg1: i32) -> (i32, i32) {
    %c0_i32 = arith.constant 0 : i32
    return %arg0, %arg1 : i32, i32
  }
  func.func @transform_3(%arg0: i32, %arg1: i32) -> (i32, i32, i32) {
    %c0_i32 = arith.constant 0 : i32
    %c0_i32_0 = arith.constant 0 : i32
    %c0_i32_1 = arith.constant 0 : i32
    return %c0_i32, %c0_i32_0, %arg1 : i32, i32, i32
  }
  func.func @transform_4(%arg0: i32, %arg1: i32) -> (i32, i32, i32) {
    %c0_i32 = arith.constant 0 : i32
    %c0_i32_0 = arith.constant 0 : i32
    %c0_i32_1 = arith.constant 0 : i32
    return %c0_i32, %c0_i32_0, %arg1 : i32, i32, i32
  }
  func.func @transform_5(%arg0: i32, %arg1: i32) -> (i32, i32) {
    %c0_i32 = arith.constant 0 : i32
    %c0_i32_0 = arith.constant 0 : i32
    return %c0_i32, %arg1 : i32, i32
  }
  func.func @transform_6(%arg0: i32, %arg1: i32) -> (i32, i32) {
    %c0_i32 = arith.constant 0 : i32
    return %arg0, %arg1 : i32, i32
  }
  func.func @transform_7(%arg0: i32, %arg1: i32) -> (i32, i32) {
    %c0_i32 = arith.constant 0 : i32
    return %arg0, %arg1 : i32, i32
  }
}

</mosaic_0001>

<bundles_post_ra>
// kernel: lstm_cell_scratch.1
= control target key start
LH: loop header
LB: loop body
LE: loop exit
PB: predicated region body
PF: predicated region fallthrough
CT: control target
= control target key end

     0   :  { %13 = vsyncpa [#allocation3], 0  ;;  %s1524_s0 = inlined_call_operand.hbm [shape: f32[8,32], index: 0, kind: input, shape index: {}]   ;;  %s1525_s1 = inlined_call_operand.hbm [shape: f32[8,128], index: 1, kind: input, shape index: {}]   ;;  %s1526_s2 = inlined_call_operand.hbm [shape: f32[8,128], index: 2, kind: input, shape index: {}]   ;;  %s1527_s3 = inlined_call_operand.hbm [shape: bf16[4,32,128], index: 3, kind: input, shape index: {}]   ;;  %s1528_s4 = inlined_call_operand.hbm [shape: bf16[4,128,128], index: 4, kind: input, shape index: {}]   ;;  %s1529_s5 = inlined_call_operand.vmem [shape: f32[4,128], index: 5, kind: input, shape index: {}]   ;;  %s1530_s6 = inlined_call_operand.hbm [shape: f32[8,128], index: 6, kind: output, shape index: {0}]   ;;  %s1531_s7 = inlined_call_operand.hbm [shape: f32[8,128], index: 7, kind: output, shape index: {1}]  }
   0x1   :  { %14 = vsyncpa [#allocation6], 0 }
   0x2   :  { %15 = vsyncpa [#allocation9], 0 }
   0x3   :  { %16 = vsyncpa [#allocation4], 0 }
   0x4   :  { %17 = vsyncpa [#allocation13], 0  ;;  %s1292_s24 = smov [#allocation5]   ;;  %s1293_s26 = smov [#allocation8]  }
   0x5   :  { %s34_s25 = sshll.u32 %s1292_s24, 4  ;;  %s53_s27 = sshll.u32 %s1293_s26, 4  ;;  %s35_s25 = int_to_ptr.vmem [resolvable:$true] %s34_s25  ;;  %s1343_s27 = int_to_ptr.vmem [resolvable:$true] %s53_s27 }
   0x6   :  { %s1128_s30 = scalar_lea.hbm %s1525_s1, 128 }
   0x7   :  { %p1129_p0 = scmp.ne.s32.totalorder %s1525_s1, %s1128_s30  ;;  %p1132_p1 = scmp.lt.u32.totalorder %s1128_s30, %s1525_s1 }
   0x9   :  { %p1134_p2 = pnand %p1132_p1, %p1129_p0 }
   0xb   :  { %1137 = shalt.err (!%p1134_p2)
}
   0xc   :  { %s1138_s12 = scalar_lea.vmem %s35_s25, 128  ;;  %p1143_p4 = scmp.lt.s32.totalorder %s35_s25, %s35_s25 }
   0xd   :  { %p1139_p3 = scmp.ne.s32.totalorder %s35_s25, %s1138_s12  ;;  %p1144_p5 = scmp.lt.s32.totalorder %s1138_s12, %s1138_s12 }
   0xf   :  { %p1145_p6 = por %p1144_p5, %p1143_p4 }
  0x11   :  { %p1146_p7 = pnand %p1145_p6, %p1139_p3 }
  0x13   :  { %1149 = shalt.err (!%p1146_p7)
}
  0x14   :  { %37 = dma.hbm_to_vmem [thread:$0]  %s1525_s1, 128, %s35_s25, [#allocation6]  }
  0x15   :  { %s1150_s17 = scalar_lea.hbm %s1527_s3, 1024 }
  0x16   :  { %p1151_p8 = scmp.ne.s32.totalorder %s1527_s3, %s1150_s17  ;;  %p1154_p9 = scmp.lt.u32.totalorder %s1150_s17, %s1527_s3 }
  0x18   :  { %p1156_p10 = pnand %p1154_p9, %p1151_p8 }
  0x1a   :  { %1159 = shalt.err (!%p1156_p10)
}
  0x1b   :  { %s1160_s22 = scalar_lea.vmem %s1343_s27, 1024  ;;  %p1165_p12 = scmp.lt.s32.totalorder %s1343_s27, %s1343_s27 }
  0x1c   :  { %p1161_p11 = scmp.ne.s32.totalorder %s1343_s27, %s1160_s22  ;;  %p1166_p13 = scmp.lt.s32.totalorder %s1160_s22, %s1160_s22 }
  0x1e   :  { %p1167_p0 = por %p1166_p13, %p1165_p12 }
  0x20   :  { %p1168_p1 = pnand %p1167_p0, %p1161_p11 }
  0x22   :  { %1171 = shalt.err (!%p1168_p1)
}
  0x23   :  { %s1294_s1 = smov 64   ;;  %s1295_s23 = smov 4  }
  0x24   :  { %59 = dma.hbm_to_vmem [thread:$0]  %s1527_s3, 1024, %s1343_s27, [#allocation9], %s1294_s1, %s1294_s1, %s1295_s23  }
  0x25   :  { %s1296_s26 = smov [#allocation2]   ;;  %s1297_s29 = smov [#allocation7]  }
  0x26   :  { %s24_s28 = sshll.u32 %s1296_s26, 4  ;;  %s44_s30 = sshll.u32 %s1297_s29, 4  ;;  %s25_s28 = int_to_ptr.vmem [resolvable:$true] %s24_s28  ;;  %s45_s30 = int_to_ptr.vmem [resolvable:$true] %s44_s30 }
  0x27   :  { %s1172_s10 = scalar_lea.hbm %s1524_s0, 128 }
  0x28   :  { %p1173_p2 = scmp.ne.s32.totalorder %s1524_s0, %s1172_s10  ;;  %p1176_p3 = scmp.lt.u32.totalorder %s1172_s10, %s1524_s0 }
  0x2a   :  { %p1178_p4 = pnand %p1176_p3, %p1173_p2 }
  0x2c   :  { %1181 = shalt.err (!%p1178_p4)
}
  0x2d   :  { %s1182_s3 = scalar_lea.vmem %s25_s28, 128  ;;  %p1187_p6 = scmp.lt.s32.totalorder %s25_s28, %s25_s28 }
  0x2e   :  { %p1183_p5 = scmp.ne.s32.totalorder %s25_s28, %s1182_s3  ;;  %p1188_p7 = scmp.lt.s32.totalorder %s1182_s3, %s1182_s3 }
  0x30   :  { %p1189_p8 = por %p1188_p7, %p1187_p6 }
  0x32   :  { %p1190_p9 = pnand %p1189_p8, %p1183_p5 }
  0x34   :  { %1193 = shalt.err (!%p1190_p9)
}
  0x35   :  { %27 = dma.hbm_to_vmem [thread:$0]  %s1524_s0, 128, %s25_s28, [#allocation3]  }
  0x36   :  { %s1194_s18 = scalar_lea.hbm %s1526_s2, 128 }
  0x37   :  { %p1195_p10 = scmp.ne.s32.totalorder %s1526_s2, %s1194_s18  ;;  %p1198_p11 = scmp.lt.u32.totalorder %s1194_s18, %s1526_s2 }
  0x39   :  { %p1200_p12 = pnand %p1198_p11, %p1195_p10 }
  0x3b   :  { %1203 = shalt.err (!%p1200_p12)
}
  0x3c   :  { %s1204_s24 = scalar_lea.vmem %s45_s30, 128  ;;  %p1209_p0 = scmp.lt.s32.totalorder %s45_s30, %s45_s30 }
  0x3d   :  { %p1205_p13 = scmp.ne.s32.totalorder %s45_s30, %s1204_s24  ;;  %p1210_p1 = scmp.lt.s32.totalorder %s1204_s24, %s1204_s24 }
  0x3f   :  { %p1211_p2 = por %p1210_p1, %p1209_p0 }
  0x41   :  { %p1212_p3 = pnand %p1211_p2, %p1205_p13 }
  0x43   :  { %1215 = shalt.err (!%p1212_p3)
}
  0x44   :  { %47 = dma.hbm_to_vmem [thread:$0]  %s1526_s2, 128, %s45_s30, [#allocation6]  }
  0x45   :  { %s1298_s26 = smov [#allocation10]   ;;  %s1216_s9 = scalar_lea.hbm %s1528_s4, 4096 }
  0x46   :  { %s65_s28 = sshll.u32 %s1298_s26, 4  ;;  %p1217_p4 = scmp.ne.s32.totalorder %s1528_s4, %s1216_s9  ;;  %s66_s28 = int_to_ptr.vmem [resolvable:$true] %s65_s28 }
  0x47   :  { %p1220_p5 = scmp.lt.u32.totalorder %s1216_s9, %s1528_s4 }
  0x49   :  { %p1222_p6 = pnand %p1220_p5, %p1217_p4 }
  0x4b   :  { %1225 = shalt.err (!%p1222_p6)
}
  0x4c   :  { %s1226_s14 = scalar_lea.vmem %s66_s28, 4096  ;;  %p1231_p8 = scmp.lt.s32.totalorder %s66_s28, %s66_s28 }
  0x4d   :  { %p1227_p7 = scmp.ne.s32.totalorder %s66_s28, %s1226_s14  ;;  %p1232_p9 = scmp.lt.s32.totalorder %s1226_s14, %s1226_s14 }
  0x4f   :  { %p1233_p10 = por %p1232_p9, %p1231_p8 }
  0x51   :  { %p1234_p11 = pnand %p1233_p10, %p1227_p7 }
  0x53   :  { %1237 = shalt.err (!%p1234_p11)
}
  0x54   :  { %71 = dma.hbm_to_vmem [thread:$0]  %s1528_s4, 4096, %s66_s28, [#allocation9], %s1294_s1, %s1294_s1, %s1295_s23  }
  0x55   :  { %1282 = dma.done.wait [#allocation3], 128  }
  0x56   :  { %1283 = vsyncadd [#allocation3], 4294967168 }
  0x57   :  { %1284 = dma.done.wait [#allocation6], 256  }
  0x58   :  { %1285 = vsyncadd [#allocation6], 4294967040 }
  0x59   :  { %1286 = dma.done.wait [#allocation9], 5120  }
  0x5a   :  { %1287 = vsyncadd [#allocation9], 4294962176  ;;  %v1299_v0 = vmov 0.0   ;;  %vm1300_vm0 = vmmov 0   ;;  %v1072_v1 = vld [vmem:[#allocation8] sm:$0xff]   ;;  %v1073_v2 = vld [vmem:[#allocation8 + $0x10] sm:$0xff]  }
  0x5b   :  { %929 = vmatprep.subr.bf16.mxu0 %v1299_v0  ;;  %957 = vmatprep.subr.bf16.mxu1 %v1299_v0  ;;  %v1074_v3 = vld [vmem:[#allocation8 + $0x8] sm:$0xff]   ;;  %v1075_v4 = vld [vmem:[#allocation8 + $0x18] sm:$0xff]   ;;  %vm111_vm1 = vcmask 261120   ;;  %v1076_v7 = vld [vmem:[#allocation10] sm:$0xff]  }
  0x5c   :  { %933 = vmatprep.mubr.msk.bf16.mxu0 %vm1300_vm0, %v1299_v0  ;;  %961 = vmatprep.mubr.msk.bf16.mxu1 %vm1300_vm0, %v1299_v0  ;;  %v90_v5 = vld [vmem:[#allocation2] sm:$0xff]  ;;  %v1077_v8 = vld [vmem:[#allocation10 + $0x40] sm:$0xff]   ;;  %v1080_v11 = vld [vmem:[#allocation10 + $0x10] sm:$0xff]  }
  0x5d   :  { %930 = vmatpush3.bf16.msra.mxu0 %v1072_v1  ;;  %958 = vmatpush3.bf16.msra.mxu1 %v1073_v2  ;;  %v1424_v6 = vpack.c.bf16 %v90_v5, %v90_v5  ;;  %v1078_v9 = vld [vmem:[#allocation10 + $0x8] sm:$0xff]   ;;  %v1081_v12 = vld [vmem:[#allocation10 + $0x50] sm:$0xff]   ;;  %v1082_v13 = vld [vmem:[#allocation10 + $0x18] sm:$0xff]  }
  0x5e   :  { %931 = vmatprep.subr.bf16.mxu0 %v1299_v0  ;;  %959 = vmatprep.subr.bf16.mxu1 %v1299_v0  ;;  %v1079_v10 = vld [vmem:[#allocation10 + $0x48] sm:$0xff]   ;;  %v1083_v14 = vld [vmem:[#allocation10 + $0x58] sm:$0xff]   ;;  %v1084_v15 = vld [vmem:[#allocation10 + $0x20] sm:$0xff]  }
  0x5f   :  { %v1085_v16 = vld [vmem:[#allocation10 + $0x60] sm:$0xff]   ;;  %v1086_v17 = vld [vmem:[#allocation10 + $0x28] sm:$0xff]   ;;  %v1088_v19 = vld [vmem:[#allocation10 + $0x30] sm:$0xff]  }
  0x60   :  { %v1087_v18 = vld [vmem:[#allocation10 + $0x68] sm:$0xff]   ;;  %v1089_v20 = vld [vmem:[#allocation10 + $0x70] sm:$0xff]   ;;  %v1090_v21 = vld [vmem:[#allocation10 + $0x38] sm:$0xff]  }
  0x61   :  { %932 = vmatpush3.bf16.msra.mxu0 %v1074_v3  ;;  %960 = vmatpush3.bf16.msra.mxu1 %v1075_v4  ;;  %v92_v22 = vld [vmem:[#allocation5] sm:$0xff]  ;;  %v1091_v23 = vld [vmem:[#allocation10 + $0x78] sm:$0xff]   ;;  %v1092_v25 = vld [vmem:[#allocation8 + $0x20] sm:$0xff]  }
  0x62   :  { %937 = vmatprep.subr.bf16.mxu0 %v1299_v0  ;;  %965 = vmatprep.subr.bf16.mxu1 %v1299_v0  ;;  %v1450_v24 = vpack.c.bf16 %v92_v22, %v92_v22  ;;  %v1093_v26 = vld [vmem:[#allocation8 + $0x30] sm:$0xff]   ;;  %v1094_v27 = vld [vmem:[#allocation8 + $0x28] sm:$0xff]   ;;  %v1095_v28 = vld [vmem:[#allocation8 + $0x38] sm:$0xff]  }
  0x63   :  { %v1096_v29 = vld [vmem:[#allocation10 + $0x80] sm:$0xff]   ;;  %v1098_v31 = vld [vmem:[#allocation10 + $0x88] sm:$0xff]   ;;  %v1100_v33 = vld [vmem:[#allocation10 + $0x90] sm:$0xff]  }
  0x64   :  { %934 = vmatmul.mubr.msk.bf16.vlgmr.msra.gmra.mrb[0].mxu0 %vm111_vm1, %v1424_v6  ;;  %962 = vmatmul.mubr.msk.bf16.vlgmr.msra.gmra.mrb[0].mxu1 %vm111_vm1, %v1424_v6  ;;  %v1097_v30 = vld [vmem:[#allocation10 + $0xc0] sm:$0xff]   ;;  %v1099_v32 = vld [vmem:[#allocation10 + $0xc8] sm:$0xff]   ;;  %v1101_v34 = vld [vmem:[#allocation10 + $0xd0] sm:$0xff]  }
  0x65   :  { %938 = vmatpush3.bf16.msra.mxu0 %v1076_v7  ;;  %966 = vmatpush3.bf16.msra.mxu1 %v1077_v8  ;;  %v1102_v35 = vld [vmem:[#allocation10 + $0x98] sm:$0xff]   ;;  %v1104_v37 = vld [vmem:[#allocation10 + $0xa0] sm:$0xff]   ;;  %v1106_v39 = vld [vmem:[#allocation10 + $0xa8] sm:$0xff]  }
  0x66   :  { %939 = vmatprep.subr.bf16.mxu0 %v1299_v0  ;;  %967 = vmatprep.subr.bf16.mxu1 %v1299_v0  ;;  %v1103_v36 = vld [vmem:[#allocation10 + $0xd8] sm:$0xff]   ;;  %v1105_v38 = vld [vmem:[#allocation10 + $0xe0] sm:$0xff]   ;;  %v1107_v40 = vld [vmem:[#allocation10 + $0xe8] sm:$0xff]  }
  0x67   :  { %953 = vmatprep.mubr.msk.bf16.mxu0 %vm1300_vm0, %v1299_v0  ;;  %981 = vmatprep.mubr.msk.bf16.mxu1 %vm1300_vm0, %v1299_v0  ;;  %v1108_v41 = vld [vmem:[#allocation10 + $0xb0] sm:$0xff]   ;;  %v1110_v43 = vld [vmem:[#allocation10 + $0xb8] sm:$0xff]   ;;  %v833_v53 = vld [vmem:[%s1529_s5] ss:$0 sm:$0xff] }
  0x68   :  { %v1109_v42 = vld [vmem:[#allocation10 + $0xf0] sm:$0xff]   ;;  %v1111_v44 = vld [vmem:[#allocation10 + $0xf8] sm:$0xff]   ;;  %v846_v54 = vld [vmem:[%s1529_s5 + $0x1] ss:$0 sm:$0xff] }
  0x69   :  { %940 = vmatpush3.bf16.msra.mxu0 %v1078_v9  ;;  %968 = vmatpush3.bf16.msra.mxu1 %v1079_v10  ;;  %v859_v63 = vld [vmem:[%s1529_s5 + $0x2] ss:$0 sm:$0xff] }
  0x6a   :  { %941 = vmatprep.subr.bf16.mxu0 %v1299_v0  ;;  %969 = vmatprep.subr.bf16.mxu1 %v1299_v0 }
  0x6d   :  { %942 = vmatpush3.bf16.msra.mxu0 %v1080_v11  ;;  %970 = vmatpush3.bf16.msra.mxu1 %v1081_v12 }
  0x6e   :  { %943 = vmatprep.subr.bf16.mxu0 %v1299_v0  ;;  %971 = vmatprep.subr.bf16.mxu1 %v1299_v0 }
  0x71   :  { %944 = vmatpush3.bf16.msra.mxu0 %v1082_v13  ;;  %972 = vmatpush3.bf16.msra.mxu1 %v1083_v14  ;;  %v791_v13 = vld [vmem:[#allocation7] sm:$0xff] }
  0x72   :  { %945 = vmatprep.subr.bf16.mxu0 %v1299_v0  ;;  %973 = vmatprep.subr.bf16.mxu1 %v1299_v0 }
  0x75   :  { %946 = vmatpush3.bf16.msra.mxu0 %v1084_v15  ;;  %974 = vmatpush3.bf16.msra.mxu1 %v1085_v16 }
  0x76   :  { %947 = vmatprep.subr.bf16.mxu0 %v1299_v0  ;;  %975 = vmatprep.subr.bf16.mxu1 %v1299_v0 }
  0x79   :  { %948 = vmatpush3.bf16.msra.mxu0 %v1086_v17  ;;  %976 = vmatpush3.bf16.msra.mxu1 %v1087_v18 }
  0x7a   :  { %949 = vmatprep.subr.bf16.mxu0 %v1299_v0  ;;  %977 = vmatprep.subr.bf16.mxu1 %v1299_v0 }
  0x7d   :  { %950 = vmatpush3.bf16.msra.mxu0 %v1088_v19  ;;  %978 = vmatpush3.bf16.msra.mxu1 %v1089_v20 }
  0x7e   :  { %951 = vmatprep.subr.bf16.mxu0 %v1299_v0  ;;  %979 = vmatprep.subr.bf16.mxu1 %v1299_v0 }
  0x81   :  { %952 = vmatpush3.bf16.msra.mxu0 %v1090_v21  ;;  %980 = vmatpush3.bf16.msra.mxu1 %v1091_v23 }
  0x82   :  { %985 = vmatprep.subr.bf16.mxu0 %v1299_v0  ;;  %1013 = vmatprep.subr.bf16.mxu1 %v1299_v0 }
  0x84   :  { %954 = vmatmul.mubr.bf16.vlgmr.msra.gmra.mrb[0].mxu0 %v1450_v24  ;;  %982 = vmatmul.mubr.bf16.vlgmr.msra.gmra.mrb[0].mxu1 %v1450_v24 }
  0x85   :  { %986 = vmatpush3.bf16.msra.mxu0 %v1092_v25  ;;  %1014 = vmatpush3.bf16.msra.mxu1 %v1093_v26 }
  0x86   :  { %987 = vmatprep.subr.bf16.mxu0 %v1299_v0  ;;  %1015 = vmatprep.subr.bf16.mxu1 %v1299_v0 }
  0x87   :  { %989 = vmatprep.mubr.msk.bf16.mxu0 %vm1300_vm0, %v1299_v0  ;;  %1017 = vmatprep.mubr.msk.bf16.mxu1 %vm1300_vm0, %v1299_v0 }
  0x89   :  { %988 = vmatpush3.bf16.msra.mxu0 %v1094_v27  ;;  %1016 = vmatpush3.bf16.msra.mxu1 %v1095_v28 }
  0x8a   :  { %993 = vmatprep.subr.bf16.mxu0 %v1299_v0  ;;  %1021 = vmatprep.subr.bf16.mxu1 %v1299_v0 }
  0x8c   :  { %990 = vmatmul.mubr.msk.bf16.vlgmr.msra.gmra.mrb[4].mxu0 %vm111_vm1, %v1424_v6  ;;  %1018 = vmatmul.mubr.msk.bf16.vlgmr.msra.gmra.mrb[4].mxu1 %vm111_vm1, %v1424_v6 }
  0x8d   :  { %994 = vmatpush3.bf16.msra.mxu0 %v1096_v29  ;;  %1022 = vmatpush3.bf16.msra.mxu1 %v1097_v30 }
  0x8e   :  { %995 = vmatprep.subr.bf16.mxu0 %v1299_v0  ;;  %1023 = vmatprep.subr.bf16.mxu1 %v1299_v0 }
  0x8f   :  { %1009 = vmatprep.mubr.msk.bf16.mxu0 %vm1300_vm0, %v1299_v0  ;;  %1037 = vmatprep.mubr.msk.bf16.mxu1 %vm1300_vm0, %v1299_v0 }
  0x91   :  { %996 = vmatpush3.bf16.msra.mxu0 %v1098_v31  ;;  %1024 = vmatpush3.bf16.msra.mxu1 %v1099_v32 }
  0x92   :  { %997 = vmatprep.subr.bf16.mxu0 %v1299_v0  ;;  %1025 = vmatprep.subr.bf16.mxu1 %v1299_v0 }
  0x95   :  { %998 = vmatpush3.bf16.msra.mxu0 %v1100_v33  ;;  %1026 = vmatpush3.bf16.msra.mxu1 %v1101_v34 }
  0x96   :  { %999 = vmatprep.subr.bf16.mxu0 %v1299_v0  ;;  %1027 = vmatprep.subr.bf16.mxu1 %v1299_v0 }
  0x99   :  { %1000 = vmatpush3.bf16.msra.mxu0 %v1102_v35  ;;  %1028 = vmatpush3.bf16.msra.mxu1 %v1103_v36 }
  0x9a   :  { %1001 = vmatprep.subr.bf16.mxu0 %v1299_v0  ;;  %1029 = vmatprep.subr.bf16.mxu1 %v1299_v0 }
  0x9d   :  { %1002 = vmatpush3.bf16.msra.mxu0 %v1104_v37  ;;  %1030 = vmatpush3.bf16.msra.mxu1 %v1105_v38 }
  0x9e   :  { %1003 = vmatprep.subr.bf16.mxu0 %v1299_v0  ;;  %1031 = vmatprep.subr.bf16.mxu1 %v1299_v0 }
  0xa1   :  { %1004 = vmatpush3.bf16.msra.mxu0 %v1106_v39  ;;  %1032 = vmatpush3.bf16.msra.mxu1 %v1107_v40 }
  0xa2   :  { %1005 = vmatprep.subr.bf16.mxu0 %v1299_v0  ;;  %1033 = vmatprep.subr.bf16.mxu1 %v1299_v0 }
  0xa5   :  { %1006 = vmatpush3.bf16.msra.mxu0 %v1108_v41  ;;  %1034 = vmatpush3.bf16.msra.mxu1 %v1109_v42 }
  0xa6   :  { %1007 = vmatprep.subr.bf16.mxu0 %v1299_v0  ;;  %1035 = vmatprep.subr.bf16.mxu1 %v1299_v0  ;;  %v871_v0 = vld [vmem:[%s1529_s5 + $0x3] ss:$0 sm:$0xff]  ;;  %s1301_s5 = smov [#allocation12]  }
  0xa7   :  { %s815_s18 = sshll.u32 %s1301_s5, 4  ;;  %s816_s18 = int_to_ptr.vmem [resolvable:$true] %s815_s18 }
  0xa8   :  { %s1238_s19 = scalar_lea.vmem %s816_s18, 128  ;;  %p1243_p13 = scmp.lt.s32.totalorder %s816_s18, %s816_s18 }
  0xa9   :  { %1008 = vmatpush3.bf16.msra.mxu0 %v1110_v43  ;;  %1036 = vmatpush3.bf16.msra.mxu1 %v1111_v44  ;;  %p1239_p12 = scmp.ne.s32.totalorder %s816_s18, %s1238_s19  ;;  %p1244_p0 = scmp.lt.s32.totalorder %s1238_s19, %s1238_s19 }
  0xab   :  { %p1245_p1 = por %p1244_p0, %p1243_p13 }
  0xac   :  { %1010 = vmatmul.mubr.bf16.vlgmr.msra.gmra.mrb[4].mxu0 %v1450_v24  ;;  %1038 = vmatmul.mubr.bf16.vlgmr.msra.gmra.mrb[4].mxu1 %v1450_v24 }
  0xad   :  { %p1246_p2 = pnand %p1245_p1, %p1239_p12 }
 0x157   :  { %v258_v45 = vpop.f32.mrb[0].mxu0  ;;  %v433_v46 = vpop.f32.mrb[0].mxu1 }
 0x158   :  { %v955_v47 = vpop.f32.mrb[1].mxu0  ;;  %v983_v48 = vpop.f32.mrb[1].mxu1  ;;  %v1041_v55 = vadd.f32 %v833_v53, %v258_v45  ;;  %v1042_v56 = vadd.f32 %v846_v54, %v433_v46 }
 0x159   :  { %v261_v49 = vpop.f32.mrb[2].mxu0  ;;  %v436_v50 = vpop.f32.mrb[2].mxu1 }
 0x15a   :  { %v956_v51 = vpop.f32.mrb[3].mxu0  ;;  %v984_v52 = vpop.f32.mrb[3].mxu1  ;;  %v842_v57 = vmul.f32 -1.442695, %v1041_v55  ;;  %v855_v58 = vmul.f32 -1.442695, %v1042_v56 }
 0x15c   :  { %1112 = vpow2.f32 %v842_v57 }
 0x15d   :  { %1114 = vpow2.f32 %v855_v58 }
 0x166   :  { %v1113_v59 = vpop.eup %1112 }
 0x167   :  { %v1115_v60 = vpop.eup %1114  ;;  %v268_v61 = vadd.f32 1.0, %v1113_v59 }
 0x168   :  { %v443_v62 = vadd.f32 1.0, %v1115_v60 }
 0x169   :  { %1116 = vrcp.f32 %v268_v61 }
 0x16a   :  { %1118 = vrcp.f32 %v443_v62 }
 0x173   :  { %v1117_v12 = vpop.eup %1116 }
 0x174   :  { %v1119_v14 = vpop.eup %1118  ;;  %v792_v16 = vmul.f32 %v1117_v12, %v791_v13 }
 0x17f   :  { %v608_v1 = vpop.f32.mrb[4].mxu0  ;;  %v778_v3 = vpop.f32.mrb[4].mxu1 }
 0x180   :  { %v1043_v2 = vadd.f32 %v859_v63, %v608_v1  ;;  %v1011_v4 = vpop.f32.mrb[5].mxu0  ;;  %v1044_v5 = vadd.f32 %v871_v0, %v778_v3  ;;  %v1039_v6 = vpop.f32.mrb[5].mxu1 }
 0x181   :  { %v611_v7 = vpop.f32.mrb[6].mxu0  ;;  %v781_v8 = vpop.f32.mrb[6].mxu1 }
 0x182   :  { %1120 = vtanh.f32 %v1043_v2  ;;  %v1012_v9 = vpop.f32.mrb[7].mxu0  ;;  %v880_v10 = vmul.f32 -1.442695, %v1044_v5  ;;  %v1040_v11 = vpop.f32.mrb[7].mxu1 }
 0x184   :  { %1122 = vpow2.f32 %v880_v10 }
 0x18c   :  { %v1121_v15 = vpop.eup %1120 }
 0x18d   :  { %v793_v17 = vmul.f32 %v1121_v15, %v1119_v14 }
 0x18e   :  { %v1123_v18 = vpop.eup %1122 }
 0x18f   :  { %v794_v19 = vadd.f32 %v793_v17, %v792_v16  ;;  %v788_v20 = vadd.f32 1.0, %v1123_v18 }
 0x191   :  { %798 = vst [vmem:[#allocation12] sm:$0xff] %v794_v19  ;;  %1124 = vtanh.f32 %v794_v19 }
 0x192   :  { %1126 = vrcp.f32 %v788_v20 }
 0x193   :  { %1249 = shalt.err (!%p1246_p2)
}
 0x194   :  { %s1250_s22 = scalar_lea.hbm %s1531_s7, 128 }
 0x195   :  { %p1251_p3 = scmp.ne.s32.totalorder %s1531_s7, %s1250_s22  ;;  %p1254_p4 = scmp.lt.u32.totalorder %s1250_s22, %s1531_s7 }
 0x197   :  { %p1256_p5 = pnand %p1254_p4, %p1251_p3 }
 0x199   :  { %1259 = shalt.err (!%p1256_p5)
}
 0x19a   :  { %818 = dma.vmem_to_hbm [thread:$0]  %s816_s18, 128, %s1531_s7, [#allocation13]  }
 0x19b   :  { %s1302_s8 = smov [#allocation11]   ;;  %v1125_v21 = vpop.eup %1124 }
 0x19c   :  { %s805_s9 = sshll.u32 %s1302_s8, 4  ;;  %v1127_v22 = vpop.eup %1126  ;;  %s806_s9 = int_to_ptr.vmem [resolvable:$true] %s805_s9 }
 0x19d   :  { %v796_v23 = vmul.f32 %v1127_v22, %v1125_v21  ;;  %s1260_s10 = scalar_lea.vmem %s806_s9, 128  ;;  %p1265_p7 = scmp.lt.s32.totalorder %s806_s9, %s806_s9 }
 0x19e   :  { %p1261_p6 = scmp.ne.s32.totalorder %s806_s9, %s1260_s10  ;;  %p1266_p8 = scmp.lt.s32.totalorder %s1260_s10, %s1260_s10 }
 0x19f   :  { %797 = vst [vmem:[#allocation11] sm:$0xff] %v796_v23 }
 0x1a0   :  { %p1267_p9 = por %p1266_p8, %p1265_p7 }
 0x1a2   :  { %p1268_p10 = pnand %p1267_p9, %p1261_p6 }
 0x1a4   :  { %1271 = shalt.err (!%p1268_p10)
}
 0x1a5   :  { %s1272_s13 = scalar_lea.hbm %s1530_s6, 128 }
 0x1a6   :  { %p1273_p11 = scmp.ne.s32.totalorder %s1530_s6, %s1272_s13  ;;  %p1276_p12 = scmp.lt.u32.totalorder %s1272_s13, %s1530_s6 }
 0x1a8   :  { %p1278_p13 = pnand %p1276_p12, %p1273_p11 }
 0x1aa   :  { %1281 = shalt.err (!%p1278_p13)
}
 0x1ab   :  { %808 = dma.vmem_to_hbm [thread:$0]  %s806_s9, 128, %s1530_s6, [#allocation4]  }
 0x1ac   :  { %1288 = dma.done.wait [#allocation4], 128  }
 0x1ad   :  { %1289 = vsyncadd [#allocation4], 4294967168 }
 0x1ae   :  { %1290 = dma.done.wait [#allocation13], 128  }
 0x1af   :  { %1291 = vsyncadd [#allocation13], 4294967168 }
 0x1b0   :  { %825 = vsyncpa [#allocation3], 1 }
 0x1b1   :  { %826 = vsyncpa [#allocation6], 1 }
 0x1b2   :  { %827 = vsyncpa [#allocation9], 1 }
 0x1b3   :  { %828 = vsyncpa [#allocation4], 1 }
 0x1b4   :  { %829 = vsyncpa [#allocation13], 1 }

</bundles_post_ra>
